<compile_context>
chip_gen: v7x
topology: tpu7x:2x2x1
jax: 0.10.0
libtpu: 0.0.40
codegen_flags: <defaults>
</compile_context>

<pallas_src>
import jax
import jax.numpy as jnp
from jax.experimental import pallas as pl
from jax.experimental.pallas import tpu as pltpu

LANE = 128
SUBLANE = 8


def _round_up(n, m):
    return ((n + m - 1) // m) * m


def mlp_kernel(x_ref, w1_ref, b1_ref, w2_ref, b2_ref, o_ref):
    # Cast the f32 x tile to the weight dtype (bf16) right before the MXU so no
    # padded/cast copy of x ever hits HBM.
    x = x_ref[...].astype(w1_ref.dtype)
    # Hidden layer: (tb, in) @ (in, 128) -> MXU matmul, f32 accumulate.
    h = jnp.dot(x, w1_ref[...], preferred_element_type=jnp.float32)
    # Bias + ReLU fused in one VPU expression (f32).
    h = jnp.maximum(h + b1_ref[...], 0.0)
    # Dropout: identity in inference/eval mode (p=0.5 only active in training).
    # TODO(synk): training-mode dropout would use pltpu.prng_seed + pltpu.prng_random_bits.
    out = jnp.dot(h.astype(w2_ref.dtype), w2_ref[...],
                  preferred_element_type=jnp.float32)
    # Narrow (tb, num_classes) store: only num_classes*4 bytes per row are written back.
    o_ref[...] = (out + b2_ref[...]).astype(o_ref.dtype)


def prepare_params(w1, b1, w2, b2, compute_dtype=jnp.bfloat16):
    """One-time parameter prep (hoisted out of the per-call forward).

    Pads hidden 100 -> 128 lanes and casts the weights to the MXU compute dtype.
    Padded hidden columns of w1 / rows of w2 carry zero weight and zero bias, so
    they never leak into the logits.  Weights are (in, out), i.e. PyTorch weight
    transposed, so the kernel computes x @ W directly (== PyTorch x @ W.T).
    """
    in_features, hidden = w1.shape
    num_classes = w2.shape[1]
    hidden_pad = _round_up(hidden, LANE)          # 100 -> 128
    cd = jnp.dtype(compute_dtype)

    w1_p = jnp.zeros((in_features, hidden_pad), cd).at[:, :hidden].set(w1.astype(cd))
    b1_p = jnp.zeros((1, hidden_pad), jnp.float32).at[:, :hidden].set(
        b1.reshape(1, hidden).astype(jnp.float32))
    w2_p = jnp.zeros((hidden_pad, num_classes), cd).at[:hidden, :].set(w2.astype(cd))
    b2_p = b2.reshape(1, num_classes).astype(jnp.float32)
    return w1_p, b1_p, w2_p, b2_p


def classificador_multiclasse(x, w1_p, b1_p, w2_p, b2_p, *,
                              max_batch_tile=4096, min_split_rows=1024):
    """Fused MLP forward (eval mode).

    x    : (B, input_size) float32 (used as-is, cast to bf16 inside the kernel)
    w1_p : (input_size, hidden_pad)   bf16   (from prepare_params)
    b1_p : (1, hidden_pad)            f32
    w2_p : (hidden_pad, num_classes)  bf16
    b2_p : (1, num_classes)           f32
    returns (B, num_classes) float32 logits
    """
    B, in_features = x.shape
    hidden_pad = w1_p.shape[1]
    num_classes = w2_p.shape[1]

    # Batch tile selection.  The kernel is HBM-bound, so the goal is simply to
    # amortize the ~0.35 us per-grid-step overhead with the biggest tile that
    # fits VMEM comfortably: at tb=4096 the double-buffered footprint (x tile,
    # out tile, weights) is only ~8 MiB -- far under the scoped-VMEM default on
    # v5e/v6e/v7x.  B itself is never padded: Pallas masks the partial last
    # block, so there is no dead-row compute or writeback.
    b8 = _round_up(B, SUBLANE)
    tb = min(max_batch_tile, b8)
    # v7x: make sure the "parallel" batch axis has >=2 grid steps when B is big
    # enough, so both TensorCores get work.
    if b8 >= min_split_rows and pl.cdiv(b8, tb) < 2:
        tb = _round_up(pl.cdiv(b8, 2), SUBLANE)
    grid = (pl.cdiv(B, tb),)

    flops = 2 * B * (in_features * hidden_pad + hidden_pad * num_classes)
    bytes_accessed = (x.size * x.dtype.itemsize
                      + w1_p.size * w1_p.dtype.itemsize
                      + w2_p.size * w2_p.dtype.itemsize
                      + (b1_p.size + b2_p.size) * 4
                      + B * num_classes * 4)

    return pl.pallas_call(
        mlp_kernel,
        out_shape=jax.ShapeDtypeStruct((B, num_classes), jnp.float32),
        grid=grid,
        in_specs=[
            # x: tiled over batch, double-buffered by the Pallas pipeline.
            pl.BlockSpec((tb, in_features), lambda i: (i, 0)),
            # weights / biases: full-array blocks, resident in VMEM across all steps.
            pl.BlockSpec((in_features, hidden_pad), lambda i: (0, 0)),
            pl.BlockSpec((1, hidden_pad), lambda i: (0, 0)),
            pl.BlockSpec((hidden_pad, num_classes), lambda i: (0, 0)),
            pl.BlockSpec((1, num_classes), lambda i: (0, 0)),
        ],
        out_specs=pl.BlockSpec((tb, num_classes), lambda i: (i, 0)),
        compiler_params=pltpu.CompilerParams(
            dimension_semantics=("parallel",)),
        cost_estimate=pl.CostEstimate(flops=flops, transcendentals=0,
                                      bytes_accessed=bytes_accessed),
    )(x, w1_p, b1_p, w2_p, b2_p)


def init_params(key, input_size, hidden_size, num_classes):
    """Deterministic parameter init mimicking nn.Linear's Kaiming-uniform bounds."""
    k1, k2, k3, k4 = jax.random.split(key, 4)
    bound1 = 1.0 / (input_size ** 0.5)
    bound2 = 1.0 / (hidden_size ** 0.5)
    # stored as (in, out) so the kernel can matmul directly (== PyTorch x @ W.T)
    w1 = jax.random.uniform(k1, (input_size, hidden_size), jnp.float32, -bound1, bound1)
    b1 = jax.random.uniform(k2, (1, hidden_size), jnp.float32, -bound1, bound1)
    w2 = jax.random.uniform(k3, (hidden_size, num_classes), jnp.float32, -bound2, bound2)
    b2 = jax.random.uniform(k4, (1, num_classes), jnp.float32, -bound2, bound2)
    return w1, b1, w2, b2


if __name__ == "__main__":
    # Small shapes consistent with the module: feature vectors -> 100 hidden -> num_classes logits.
    batch = 8
    input_size = 48
    hidden_size = 100
    num_classes = 7

    key = jax.random.PRNGKey(0)
    kx, kp = jax.random.split(key)
    x = jax.random.normal(kx, (batch, input_size), dtype=jnp.float32)
    w1, b1, w2, b2 = init_params(kp, input_size, hidden_size, num_classes)

    # One-time weight prep (padding + bf16 cast), hoisted out of the forward.
    w1_p, b1_p, w2_p, b2_p = prepare_params(w1, b1, w2, b2)
    w1_p, b1_p, w2_p, b2_p = jax.block_until_ready((w1_p, b1_p, w2_p, b2_p))

    fwd = jax.jit(classificador_multiclasse)
    out = fwd(x, w1_p, b1_p, w2_p, b2_p)
    out = jax.block_until_ready(out)
    assert out.shape == (batch, num_classes)

    # Reference with identical bf16 operands / f32 accumulation as the kernel.
    xc, w1c, w2c = (t.astype(jnp.bfloat16) for t in (x, w1, w2))
    h_ref = jnp.maximum(jnp.dot(xc, w1c, preferred_element_type=jnp.float32) + b1, 0.0)
    ref = jnp.dot(h_ref.astype(jnp.bfloat16), w2c, preferred_element_type=jnp.float32) + b2
    assert jnp.allclose(out, ref, atol=1e-3, rtol=1e-3), float(jnp.max(jnp.abs(out - ref)))

    # Looser check against the pure-f32 eval-mode forward (bf16 operand rounding).
    ref32 = jnp.maximum(x @ w1 + b1, 0.0) @ w2 + b2
    assert jnp.allclose(out, ref32, atol=5e-2, rtol=5e-2)

    print("KERNEL_OK")
</pallas_src>

<mosaic_0001>
module attributes {stable_mosaic.version = 11 : i64} {
  func.func @mlp_kernel(%arg0: i32, %arg1: memref<8x48xf32, #tpu.memory_space<vmem>>, %arg2: memref<48x128xbf16, #tpu.memory_space<vmem>>, %arg3: memref<1x128xf32, #tpu.memory_space<vmem>>, %arg4: memref<128x7xbf16, #tpu.memory_space<vmem>>, %arg5: memref<1x7xf32, #tpu.memory_space<vmem>>, %arg6: memref<8x7xf32, #tpu.memory_space<vmem>>) attributes {dimension_semantics = [#tpu.dimension_semantics<parallel>], iteration_bounds = array<i64: 1>, scalar_prefetch = 0 : i64, scratch_operands = 0 : i64, tpu.core_type = #tpu.core_type<tc>, window_params = [{transform_indices = @transform_0, window_bounds = array<i64: 8, 48>}, {pipeline_mode = #tpu.pipeline_mode<synchronous>, transform_indices = @transform_1, window_bounds = array<i64: 48, 128>}, {pipeline_mode = #tpu.pipeline_mode<synchronous>, transform_indices = @transform_2, window_bounds = array<i64: 1, 128>}, {pipeline_mode = #tpu.pipeline_mode<synchronous>, transform_indices = @transform_3, window_bounds = array<i64: 128, 7>}, {pipeline_mode = #tpu.pipeline_mode<synchronous>, transform_indices = @transform_4, window_bounds = array<i64: 1, 7>}, {transform_indices = @transform_5, window_bounds = array<i64: 8, 7>}]} {
    %c0 = arith.constant 0 : index
    %c0_0 = arith.constant 0 : index
    %0 = vector.load %arg1[%c0, %c0_0] : memref<8x48xf32, #tpu.memory_space<vmem>>, vector<8x48xf32>
    %1 = arith.truncf %0 : vector<8x48xf32> to vector<8x48xbf16>
    %c0_1 = arith.constant 0 : index
    %c0_2 = arith.constant 0 : index
    %2 = vector.load %arg2[%c0_1, %c0_2] : memref<48x128xbf16, #tpu.memory_space<vmem>>, vector<48x128xbf16>
    %cst = arith.constant dense<0.000000e+00> : vector<8x128xf32>
    %3 = tpu.matmul %1, %2, %cst {dimension_numbers = #tpu.dot_dimension_numbers<[1], [0], [0], [1], [0, 0, 1, 1], [], []>} : vector<8x48xbf16>, vector<48x128xbf16>, vector<8x128xf32> -> vector<8x128xf32>
    %c0_3 = arith.constant 0 : index
    %c0_4 = arith.constant 0 : index
    %4 = vector.load %arg3[%c0_3, %c0_4] : memref<1x128xf32, #tpu.memory_space<vmem>>, vector<1x128xf32>
    %5 = vector.broadcast %4 : vector<1x128xf32> to vector<8x128xf32>
    %6 = arith.addf %3, %5 : vector<8x128xf32>
    %cst_5 = arith.constant 0.000000e+00 : f32
    %7 = vector.broadcast %cst_5 : f32 to vector<8x128xf32>
    %8 = arith.maximumf %6, %7 : vector<8x128xf32>
    %9 = arith.truncf %8 : vector<8x128xf32> to vector<8x128xbf16>
    %c0_6 = arith.constant 0 : index
    %c0_7 = arith.constant 0 : index
    %10 = vector.load %arg4[%c0_6, %c0_7] : memref<128x7xbf16, #tpu.memory_space<vmem>>, vector<128x7xbf16>
    %cst_8 = arith.constant dense<0.000000e+00> : vector<8x7xf32>
    %11 = tpu.matmul %9, %10, %cst_8 {dimension_numbers = #tpu.dot_dimension_numbers<[1], [0], [0], [1], [0, 0, 1, 1], [], []>} : vector<8x128xbf16>, vector<128x7xbf16>, vector<8x7xf32> -> vector<8x7xf32>
    %c0_9 = arith.constant 0 : index
    %c0_10 = arith.constant 0 : index
    %12 = vector.load %arg5[%c0_9, %c0_10] : memref<1x7xf32, #tpu.memory_space<vmem>>, vector<1x7xf32>
    %13 = vector.broadcast %12 : vector<1x7xf32> to vector<8x7xf32>
    %14 = arith.addf %11, %13 : vector<8x7xf32>
    %c0_11 = arith.constant 0 : index
    %c0_12 = arith.constant 0 : index
    %15 = vector.load %arg6[%c0_11, %c0_12] : memref<8x7xf32, #tpu.memory_space<vmem>>, vector<8x7xf32>
    tpu.vector_store %arg6[%c0_11, %c0_12], %14 {strides = array<i32>} : memref<8x7xf32, #tpu.memory_space<vmem>>, vector<8x7xf32>,
    return
  }
  func.func @transform_0(%arg0: i32) -> (i32, i32) {
    %c0_i32 = arith.constant 0 : i32
    %c0_i32_0 = arith.constant 0 : i32
    return %arg0, %c0_i32 : i32, i32
  }
  func.func @transform_1(%arg0: i32) -> (i32, i32) {
    %c0_i32 = arith.constant 0 : i32
    %c0_i32_0 = arith.constant 0 : i32
    %c0_i32_1 = arith.constant 0 : i32
    return %c0_i32, %c0_i32_0 : i32, i32
  }
  func.func @transform_2(%arg0: i32) -> (i32, i32) {
    %c0_i32 = arith.constant 0 : i32
    %c0_i32_0 = arith.constant 0 : i32
    %c0_i32_1 = arith.constant 0 : i32
    return %c0_i32, %c0_i32_0 : i32, i32
  }
  func.func @transform_3(%arg0: i32) -> (i32, i32) {
    %c0_i32 = arith.constant 0 : i32
    %c0_i32_0 = arith.constant 0 : i32
    %c0_i32_1 = arith.constant 0 : i32
    return %c0_i32, %c0_i32_0 : i32, i32
  }
  func.func @transform_4(%arg0: i32) -> (i32, i32) {
    %c0_i32 = arith.constant 0 : i32
    %c0_i32_0 = arith.constant 0 : i32
    %c0_i32_1 = arith.constant 0 : i32
    return %c0_i32, %c0_i32_0 : i32, i32
  }
  func.func @transform_5(%arg0: i32) -> (i32, i32) {
    %c0_i32 = arith.constant 0 : i32
    %c0_i32_0 = arith.constant 0 : i32
    return %arg0, %c0_i32 : i32, i32
  }
}

</mosaic_0001>

<bundles_post_ra>
// kernel: classificador_multiclasse.1
= control target key start
LH: loop header
LB: loop body
LE: loop exit
PB: predicated region body
PF: predicated region fallthrough
CT: control target
= control target key end

     0   :  { %v323_v1 = vmov 0.0   ;;  %vm324_vm0 = vmmov 0   ;;  %vm55_vm1 = vcmask 392192   ;;  %s410_s0 = inlined_call_operand.vmem [shape: f32[8,48], index: 0, kind: input, shape index: {}]   ;;  %s411_s1 = inlined_call_operand.vmem [shape: bf16[48,128], index: 1, kind: input, shape index: {}]   ;;  %s412_s2 = inlined_call_operand.vmem [shape: f32[1,128], index: 2, kind: input, shape index: {}]   ;;  %s413_s3 = inlined_call_operand.vmem [shape: bf16[128,7], index: 3, kind: input, shape index: {}]   ;;  %s414_s4 = inlined_call_operand.vmem [shape: f32[1,7], index: 4, kind: input, shape index: {}]   ;;  %s415_s5 = inlined_call_operand.hbm [shape: f32[8,7], index: 5, kind: output, shape index: {}]  }
   0x1   :  { %v288_v0 = vld [vmem:[%s411_s1] sm:$0xff]   ;;  %255 = vmatprep.subr.bf16.mxu0 %v323_v1  ;;  %265 = vmatprep.subr.bf16.mxu1 %v323_v1  ;;  %v289_v2 = vld [vmem:[%s411_s1 + $0x8] sm:$0xff]   ;;  %v290_v3 = vld [vmem:[%s411_s1 + $0x10] sm:$0xff]  }
   0x2   :  { %256 = vmatpush3.bf16.msra.mxu0 %v288_v0  ;;  %261 = vmatprep.mubr.msk.bf16.mxu0 %vm324_vm0, %v323_v1  ;;  %v291_v4 = vld [vmem:[%s413_s3] sm:$0xff]   ;;  %v292_v6 = vld [vmem:[%s413_s3 + $0x8] sm:$0xff]   ;;  %v293_v8 = vld [vmem:[%s413_s3 + $0x10] sm:$0xff]  }
   0x3   :  { %257 = vmatprep.subr.bf16.mxu0 %v323_v1  ;;  %281 = vmatprep.mubr.msk.bf16.mxu1 %vm324_vm0, %v323_v1  ;;  %v22_v5 = vld [vmem:[%s410_s0] sm:$0xff] }
   0x4   :  { %266 = vmatpush3.bf16.msra.mxu1 %v291_v4  ;;  %v23_v7 = vpack.c.bf16 %v22_v5, %v22_v5 }
   0x5   :  { %267 = vmatprep.subr.bf16.mxu1 %v323_v1 }
   0x6   :  { %258 = vmatpush3.bf16.msra.mxu0 %v289_v2 }
   0x7   :  { %259 = vmatprep.subr.bf16.mxu0 %v323_v1 }
   0x8   :  { %268 = vmatpush3.bf16.msra.mxu1 %v292_v6 }
   0x9   :  { %269 = vmatprep.subr.bf16.mxu1 %v323_v1 }
   0xa   :  { %260 = vmatpush3.bf16.msra.mxu0 %v290_v3 }
   0xb   :  { %10 = vsyncpa [#allocation3], 0  ;;  %v294_v9 = vld [vmem:[%s413_s3 + $0x18] sm:$0xff]   ;;  %v295_v10 = vld [vmem:[%s413_s3 + $0x20] sm:$0xff]   ;;  %s325_s19 = smov [#allocation2]   ;;  %vm212_vm2 = vcmask 56320  }
   0xc   :  { %270 = vmatpush3.bf16.msra.mxu1 %v293_v8  ;;  %v296_v11 = vld [vmem:[%s413_s3 + $0x28] sm:$0xff]   ;;  %v297_v12 = vld [vmem:[%s413_s3 + $0x30] sm:$0xff]   ;;  %v298_v13 = vld [vmem:[%s413_s3 + $0x38] sm:$0xff]   ;;  %s220_s20 = sshll.u32 %s325_s19, 4  ;;  %s221_s20 = int_to_ptr.vmem [resolvable:$true] %s220_s20 }
   0xd   :  { %262 = vmatmul.mubr.msk.bf16.vlgmr.msra.gmra.mrb[0].mxu0 %vm55_vm1, %v23_v7  ;;  %271 = vmatprep.subr.bf16.mxu1 %v323_v1  ;;  %v228_v14 = vld [vmem:[%s412_s2] ss:$0 sm:$0xff]  ;;  %s299_s2 = scalar_lea.vmem %s221_s20, 128  ;;  %p304_p1 = scmp.lt.s32.totalorder %s221_s20, %s221_s20 }
   0xe   :  { %v233_v22 = vld [vmem:[%s414_s4] ss:$0 sm:$0xff]  ;;  %p300_p0 = scmp.ne.s32.totalorder %s221_s20, %s299_s2  ;;  %p305_p2 = scmp.lt.s32.totalorder %s299_s2, %s299_s2 }
  0x10   :  { %272 = vmatpush3.bf16.msra.mxu1 %v294_v9  ;;  %p306_p3 = por %p305_p2, %p304_p1 }
  0x11   :  { %273 = vmatprep.subr.bf16.mxu1 %v323_v1 }
  0x12   :  { %p307_p4 = pnand %p306_p3, %p300_p0 }
  0x14   :  { %274 = vmatpush3.bf16.msra.mxu1 %v295_v10 }
  0x15   :  { %275 = vmatprep.subr.bf16.mxu1 %v323_v1 }
  0x18   :  { %276 = vmatpush3.bf16.msra.mxu1 %v296_v11 }
  0x19   :  { %277 = vmatprep.subr.bf16.mxu1 %v323_v1 }
  0x1c   :  { %278 = vmatpush3.bf16.msra.mxu1 %v297_v12 }
  0x1d   :  { %279 = vmatprep.subr.bf16.mxu1 %v323_v1 }
  0x20   :  { %280 = vmatpush3.bf16.msra.mxu1 %v298_v13 }
  0xe0   :  { %v93_v15 = vpop.f32.mrb[0].mxu0 }
  0xe1   :  { %v94_v16 = vadd.f32 %v228_v14, %v93_v15  ;;  %v263_v17 = vpop.f32.mrb[1].mxu0 }
  0xe2   :  { %v96_v18 = vpop.f32.mrb[2].mxu0 }
  0xe3   :  { %v99_v19 = vmax.f32 %v94_v16, 0.0  ;;  %v264_v20 = vpop.f32.mrb[3].mxu0 }
  0xe5   :  { %v100_v21 = vpack.c.bf16 %v99_v19, %v99_v19 }
  0xe7   :  { %282 = vmatmul.mubr.bf16.vlgmr.msra.gmra.mrb[0].mxu1 %v100_v21 }
 0x1ba   :  { %v206_v23 = vpop.f32.mrb[0].mxu1 }
 0x1bb   :  { %v207_v24 = vadd.f32 %v233_v22, %v206_v23  ;;  %v283_v25 = vpop.f32.mrb[1].mxu1 }
 0x1bc   :  { %v209_v26 = vpop.f32.mrb[2].mxu1 }
 0x1bd   :  { %v284_v27 = vpop.f32.mrb[3].mxu1  ;;  %213 = vst.msk [vmem:[#allocation2] sm:$0xff] %vm212_vm2, %v207_v24 }
 0x1be   :  { %310 = shalt.err (!%p307_p4)
}
 0x1bf   :  { %s311_s4 = scalar_lea.hbm %s415_s5, 128 }
 0x1c0   :  { %p312_p5 = scmp.ne.s32.totalorder %s415_s5, %s311_s4  ;;  %p315_p6 = scmp.lt.u32.totalorder %s311_s4, %s415_s5 }
 0x1c2   :  { %p317_p7 = pnand %p315_p6, %p312_p5 }
 0x1c4   :  { %320 = shalt.err (!%p317_p7)
}
 0x1c5   :  { %223 = dma.vmem_to_hbm [thread:$0]  %s221_s20, 128, %s415_s5, [#allocation3]  }
 0x1c6   :  { %321 = dma.done.wait [#allocation3], 128  }
 0x1c7   :  { %322 = vsyncadd [#allocation3], 4294967168 }
 0x1c8   :  { %227 = vsyncpa [#allocation3], 1 }

</bundles_post_ra>
